<compile_context>
chip_gen: v6e
topology: v6e:2x2x1
jax: 0.10.0
libtpu: 0.0.40
codegen_flags: <defaults>
</compile_context>

<pallas_src>
import math

import jax
import jax.numpy as jnp
from jax.experimental import pallas as pl
from jax.experimental.pallas import tpu as pltpu


def _make_ss2d_kernel(Bt, H, W, C, Din):
    """Fused SS2D kernel for one batch tile, operating on (M = Bt*H*W, channels)."""
    M = Bt * H * W
    PAD = ((W + 1 + 7) // 8) * 8          # sublane-aligned zero pad for conv shifts
    f32, bf16 = jnp.float32, jnp.bfloat16
    eps = 1e-5

    def kernel(x_ref, w_in_ref, conv_w_ref, conv_b_ref, dt_b_ref,
               w_m1_ref, w_m2_ref, ln_g_ref, ln_b_ref, w_out_ref, out_ref):
        # ---- fused in_proj: one (M, C) @ (C, 2*Din) MXU pass (x and z halves) ----
        xf = x_ref[...]                                               # bf16 (M, C)
        xz = jnp.dot(xf, w_in_ref[...], preferred_element_type=f32)  # (M, 2*Din) f32
        x_part = xz[:, :Din]
        z = xz[:, Din:]

        # ---- depthwise 3x3 conv (padding=1) + bias + SiLU, fully in registers ----
        # Flattened formulation: tap (a, b) of output row m reads row
        # m + (a-1)*W + (b-1); taps whose source pixel lies outside the image are
        # masked to zero (this also covers batch-image boundaries).
        # Both position iotas run along the second-minor dim (natively supported).
        hw_pos = jax.lax.broadcasted_iota(
            jnp.int32, (Bt, H * W, Din), 1).reshape(M, Din)           # m mod (H*W)
        w_pos = jax.lax.broadcasted_iota(
            jnp.int32, (Bt * H, W, Din), 1).reshape(M, Din)           # m mod W
        hmask = {0: hw_pos >= W, 2: hw_pos < (H - 1) * W}             # h>=1 / h<=H-2
        wmask = {0: w_pos >= 1, 2: w_pos <= W - 2}                    # w>=1 / w<=W-2

        zpad = jnp.zeros((PAD, Din), f32)
        x_ext = jnp.concatenate([zpad, x_part, zpad], axis=0)        # (M + 2*PAD, Din)

        conv = jnp.zeros((M, Din), f32)
        for a in range(3):
            for b in range(3):
                s = (a - 1) * W + (b - 1)
                tap = x_ext[PAD + s:PAD + s + M, :]
                mask = None
                if a != 1:
                    mask = hmask[a]
                if b != 1:
                    mask = wmask[b] if mask is None else mask & wmask[b]
                if mask is not None:
                    tap = jnp.where(mask, tap, 0.0)
                k = a * 3 + b
                conv = conv + tap * conv_w_ref[k:k + 1, :]
        conv = jax.nn.silu(conv + conv_b_ref[...])

        # ---- "mamba" MLP over the flattened sequence (+ dt_bias) ----
        x_seq = conv + dt_b_ref[...]
        h1 = jax.nn.silu(jnp.dot(x_seq.astype(bf16), w_m1_ref[...],
                                 preferred_element_type=f32))
        h2 = jnp.dot(h1.astype(bf16), w_m2_ref[...], preferred_element_type=f32)

        # ---- LayerNorm over channels (f32) ----
        mean = jnp.mean(h2, axis=-1, keepdims=True)
        var = jnp.mean((h2 - mean) ** 2, axis=-1, keepdims=True)
        xn = (h2 - mean) * jax.lax.rsqrt(var + eps)
        xn = xn * ln_g_ref[...] + ln_b_ref[...]

        # ---- gate with SiLU(z), then out_proj ----
        xn = xn * jax.nn.silu(z)
        out = jnp.dot(xn.astype(bf16), w_out_ref[...], preferred_element_type=f32)
        out_ref[...] = out.astype(out_ref.dtype)
        # dropout == Identity (dropout=0.0), nothing to do.

    return kernel


def _vmem_limits():
    """(vmem_limit_bytes, per-step tile budget) derived from the actual chip.

    ~70% of physical VMEM as the scoped limit (v7x: ~45 of 64 MiB, v5e/v6e:
    capped at 96 of 128 MiB), ~1/3 of that as the batch-tile budget.  Falls back
    to a 64 MiB capacity (safe on every generation) if the query is unavailable.
    """
    cap = 64 * 1024 * 1024
    try:
        info = pltpu.get_tpu_info()
        for attr in ("vmem_capacity_bytes", "vmem_bytes", "vmem_size_bytes"):
            v = getattr(info, attr, None)
            if v:
                cap = int(v)
                break
    except Exception:
        pass
    limit = max(32 * 1024 * 1024, min(cap * 7 // 10, 96 * 1024 * 1024))
    budget = min(limit // 3, 32 * 1024 * 1024)
    return limit, budget


def _padded_bytes(rows, cols, itemsize):
    """VMEM bytes including (sublane, lane) tile padding: lanes round to 128,
    sublanes to 8 (f32) / 16 (bf16) / 32 (int8)."""
    sub = 8 * (4 // itemsize)
    r = -(-rows // sub) * sub
    c = -(-cols // 128) * 128
    return r * c * itemsize


def _pick_block_batch(B, H, W, C, Din, budget):
    """Largest divisor of B whose tiling-aware per-step footprint fits `budget`,
    capped so the grid keeps >=2 (>=4 for larger B) steps for megacore sharding
    and DMA prefetch/writeback overlap."""
    hw = H * W
    pad_rows = ((W + 1 + 7) // 8) * 8

    def est(bt):
        m = bt * hw
        io = 2 * _padded_bytes(m, C, 2) + 2 * _padded_bytes(m, C, 4)   # dbl-buffered blocks
        wts = 2 * (_padded_bytes(C, 2 * Din, 2) + 2 * _padded_bytes(Din, Din, 2)
                   + _padded_bytes(Din, C, 2) + _padded_bytes(9, Din, 4)
                   + 4 * _padded_bytes(1, Din, 4))
        live = (_padded_bytes(m, 2 * Din, 4)                 # xz
                + _padded_bytes(m + 2 * pad_rows, Din, 4)    # padded conv source
                + 6 * _padded_bytes(m, Din, 4)               # conv / h1 / h2 / xn / masks
                + 2 * _padded_bytes(m, Din, 2)               # bf16 matmul operands
                + _padded_bytes(m, C, 4))                    # out before store
        return io + wts + live

    aligned = [bt for bt in range(1, B + 1)
               if B % bt == 0 and ((bt * hw) % 8 == 0 or bt == B)]
    fitting = [bt for bt in aligned if est(bt) <= budget]
    pool = fitting if fitting else aligned[:1]
    min_steps = 1 if B == 1 else (2 if B < 8 else 4)
    cap_bt = max(1, B // min_steps)
    capped = [bt for bt in pool if bt <= cap_bt and bt * hw <= 4096]
    return max(capped) if capped else min(pool)


def ss2d_forward(x, params, block_batch=None):
    B, H, W, C = x.shape
    Din = params["w_m1"].shape[0]
    vmem_limit, budget = _vmem_limits()
    Bt = block_batch if block_batch is not None else _pick_block_batch(B, H, W, C, Din, budget)
    assert B % Bt == 0, "block_batch must divide the batch size"
    assert (Bt * H * W) % 8 == 0 or Bt == B, "batch tile must give 8-aligned rows"
    M_blk = Bt * H * W
    Mt = B * H * W

    bf16 = jnp.bfloat16
    # Wrapper-side (free) flatten to (rows, channels) + bf16 cast of the activation:
    # halves activation HBM traffic and removes every reshape from the kernel.
    x2d = x.reshape(Mt, C).astype(bf16)
    w_in = params["w_in"].astype(bf16)          # fused (C, 2*Din) in_proj weight
    w_m1 = params["w_m1"].astype(bf16)
    w_m2 = params["w_m2"].astype(bf16)
    w_out = params["w_out"].astype(bf16)

    def wspec(shape):
        return pl.BlockSpec(shape, lambda i: (0,) * len(shape))

    flops = 2 * Mt * (C * 2 * Din + 2 * Din * Din + Din * C) + 2 * Mt * 9 * Din
    transcendentals = Mt * (3 * Din + 1)
    bytes_accessed = (Mt * C * (2 + 4)
                      + 2 * (2 * C * Din + 2 * Din * Din + Din * C)
                      + 4 * (9 * Din + 4 * Din))
    cost = pl.CostEstimate(flops=flops, transcendentals=transcendentals,
                           bytes_accessed=bytes_accessed)

    kernel = _make_ss2d_kernel(Bt, H, W, C, Din)

    out2d = pl.pallas_call(
        kernel,
        out_shape=jax.ShapeDtypeStruct((Mt, C), x.dtype),
        grid_spec=pltpu.PrefetchScalarGridSpec(
            num_scalar_prefetch=0,
            grid=(B // Bt,),
            in_specs=[
                pl.BlockSpec((M_blk, C), lambda i: (i, 0)),   # x rows tile (bf16)
                wspec((C, 2 * Din)),    # fused in_proj weight (bf16)
                wspec((9, Din)),        # depthwise conv taps (f32)
                wspec((1, Din)),        # conv bias (f32)
                wspec((1, Din)),        # dt_bias (f32)
                wspec((Din, Din)),      # mamba linear 1 (bf16)
                wspec((Din, Din)),      # mamba linear 2 (bf16)
                wspec((1, Din)),        # LayerNorm gamma (f32)
                wspec((1, Din)),        # LayerNorm beta (f32)
                wspec((Din, C)),        # out_proj (bf16)
            ],
            out_specs=pl.BlockSpec((M_blk, C), lambda i: (i, 0)),
        ),
        compiler_params=pltpu.CompilerParams(
            dimension_semantics=("parallel",),
            vmem_limit_bytes=vmem_limit,
        ),
        cost_estimate=cost,
    )(x2d, w_in, params["conv_w"], params["conv_b"], params["dt_bias"],
      w_m1, w_m2, params["ln_g"], params["ln_b"], w_out)
    return out2d.reshape(B, H, W, C)


def ss2d_reference(x, params):
    """Pure-JAX reference mirroring the PyTorch forward, with the same precision
    policy as the kernel (bf16 matmul operands, f32 accumulate; f32 elsewhere)."""
    B, H, W, C = x.shape
    Din = params["w_m1"].shape[0]
    bf16 = jnp.bfloat16

    def mm(a, w):
        return jnp.dot(a.astype(bf16), w.astype(bf16),
                       preferred_element_type=jnp.float32)

    x_part = mm(x, params["w_in"][:, :Din])
    z = mm(x, params["w_in"][:, Din:])
    xp = jnp.pad(x_part, ((0, 0), (1, 1), (1, 1), (0, 0)))
    conv = jnp.zeros_like(x_part)
    for a in range(3):
        for b in range(3):
            conv = conv + xp[:, a:a + H, b:b + W, :] * \
                params["conv_w"][a * 3 + b][None, None, None, :]
    conv = jax.nn.silu(conv + params["conv_b"].reshape(1, 1, 1, Din))
    x_seq = conv + params["dt_bias"].reshape(1, 1, 1, Din)
    h = mm(jax.nn.silu(mm(x_seq, params["w_m1"])), params["w_m2"])
    mean = h.mean(-1, keepdims=True)
    var = ((h - mean) ** 2).mean(-1, keepdims=True)
    xn = (h - mean) * jax.lax.rsqrt(var + 1e-5)
    xn = xn * params["ln_g"].reshape(1, 1, 1, Din) + params["ln_b"].reshape(1, 1, 1, Din)
    xn = xn * jax.nn.silu(z)
    return mm(xn, params["w_out"])


def make_params(key, d_model, d_inner):
    ks = jax.random.split(key, 8)
    s_in = 1.0 / math.sqrt(d_model)
    s_inner = 1.0 / math.sqrt(d_inner)
    # PyTorch Linear weight is (out, in); we store the transpose so y = x @ W.
    w_in = jax.random.normal(ks[0], (d_model, 2 * d_inner), jnp.float32) * s_in
    # Conv2d depthwise weight (d_inner, 1, 3, 3) -> (9, d_inner) with k = kh*3 + kw.
    conv_w_t = jax.random.normal(ks[1], (d_inner, 3, 3), jnp.float32) * (1.0 / 3.0)
    conv_w = conv_w_t.reshape(d_inner, 9).T
    conv_b = jax.random.normal(ks[2], (1, d_inner), jnp.float32) * 0.1
    dt_bias = jax.random.normal(ks[3], (1, d_inner), jnp.float32) * 0.1
    w_m1 = jax.random.normal(ks[4], (d_inner, d_inner), jnp.float32) * s_inner
    w_m2 = jax.random.normal(ks[5], (d_inner, d_inner), jnp.float32) * s_inner
    ln_g = jnp.ones((1, d_inner), jnp.float32)
    ln_b = jnp.zeros((1, d_inner), jnp.float32)
    w_out = jax.random.normal(ks[6], (d_inner, d_model), jnp.float32) * s_inner
    return {"w_in": w_in, "conv_w": conv_w, "conv_b": conv_b, "dt_bias": dt_bias,
            "w_m1": w_m1, "w_m2": w_m2, "ln_g": ln_g, "ln_b": ln_b, "w_out": w_out}


if __name__ == "__main__":
    key = jax.random.PRNGKey(0)
    B, H, W, d_model = 2, 8, 8, 16
    d_inner = int(1.5 * d_model)  # expand = 1.5

    kx, kp = jax.random.split(key)
    x = jax.random.normal(kx, (B, H, W, d_model), jnp.float32)
    params = make_params(kp, d_model, d_inner)

    out = jax.block_until_ready(ss2d_forward(x, params))
    ref = jax.block_until_ready(ss2d_reference(x, params))

    assert out.shape == (B, H, W, d_model)
    assert jnp.allclose(out, ref, rtol=1e-2, atol=1e-2), \
        f"max abs diff {jnp.max(jnp.abs(out - ref))}"
    print("KERNEL_OK")
</pallas_src>

<mosaic_0001>
module attributes {stable_mosaic.version = 11 : i64} {
  func.func @kernel(%arg0: i32, %arg1: memref<64x16xbf16, #tpu.memory_space<vmem>>, %arg2: memref<16x48xbf16, #tpu.memory_space<vmem>>, %arg3: memref<9x24xf32, #tpu.memory_space<vmem>>, %arg4: memref<1x24xf32, #tpu.memory_space<vmem>>, %arg5: memref<1x24xf32, #tpu.memory_space<vmem>>, %arg6: memref<24x24xbf16, #tpu.memory_space<vmem>>, %arg7: memref<24x24xbf16, #tpu.memory_space<vmem>>, %arg8: memref<1x24xf32, #tpu.memory_space<vmem>>, %arg9: memref<1x24xf32, #tpu.memory_space<vmem>>, %arg10: memref<24x16xbf16, #tpu.memory_space<vmem>>, %arg11: memref<64x16xf32, #tpu.memory_space<vmem>>) attributes {dimension_semantics = [#tpu.dimension_semantics<parallel>], iteration_bounds = array<i64: 2>, scalar_prefetch = 0 : i64, scratch_operands = 0 : i64, tpu.core_type = #tpu.core_type<tc>, window_params = [{transform_indices = @transform_0, window_bounds = array<i64: 64, 16>}, {pipeline_mode = #tpu.pipeline_mode<synchronous>, transform_indices = @transform_1, window_bounds = array<i64: 16, 48>}, {pipeline_mode = #tpu.pipeline_mode<synchronous>, transform_indices = @transform_2, window_bounds = array<i64: 9, 24>}, {pipeline_mode = #tpu.pipeline_mode<synchronous>, transform_indices = @transform_3, window_bounds = array<i64: 1, 24>}, {pipeline_mode = #tpu.pipeline_mode<synchronous>, transform_indices = @transform_4, window_bounds = array<i64: 1, 24>}, {pipeline_mode = #tpu.pipeline_mode<synchronous>, transform_indices = @transform_5, window_bounds = array<i64: 24, 24>}, {pipeline_mode = #tpu.pipeline_mode<synchronous>, transform_indices = @transform_6, window_bounds = array<i64: 24, 24>}, {pipeline_mode = #tpu.pipeline_mode<synchronous>, transform_indices = @transform_7, window_bounds = array<i64: 1, 24>}, {pipeline_mode = #tpu.pipeline_mode<synchronous>, transform_indices = @transform_8, window_bounds = array<i64: 1, 24>}, {pipeline_mode = #tpu.pipeline_mode<synchronous>, transform_indices = @transform_9, window_bounds = array<i64: 24, 16>}, {transform_indices = @transform_10, window_bounds = array<i64: 64, 16>}]} {
    %c0 = arith.constant 0 : index
    %c0_0 = arith.constant 0 : index
    %0 = vector.load %arg1[%c0, %c0_0] : memref<64x16xbf16, #tpu.memory_space<vmem>>, vector<64x16xbf16>
    %c0_1 = arith.constant 0 : index
    %c0_2 = arith.constant 0 : index
    %1 = vector.load %arg2[%c0_1, %c0_2] : memref<16x48xbf16, #tpu.memory_space<vmem>>, vector<16x48xbf16>
    %cst = arith.constant dense<0.000000e+00> : vector<64x48xf32>
    %2 = tpu.matmul %0, %1, %cst {dimension_numbers = #tpu.dot_dimension_numbers<[1], [0], [0], [1], [0, 0, 1, 1], [], []>} : vector<64x16xbf16>, vector<16x48xbf16>, vector<64x48xf32> -> vector<64x48xf32>
    %3 = vector.extract_strided_slice %2 {offsets = [0, 0], sizes = [64, 24], strides = [1, 1]} : vector<64x48xf32> to vector<64x24xf32>
    %4 = vector.extract_strided_slice %2 {offsets = [0, 24], sizes = [64, 24], strides = [1, 1]} : vector<64x48xf32> to vector<64x24xf32>
    %5 = tpu.iota {dimensions = array<i32: 1>} : vector<1x64x24xi32>
    %6 = vector.shape_cast %5 : vector<1x64x24xi32> to vector<64x24xi32>
    %7 = tpu.iota {dimensions = array<i32: 1>} : vector<8x8x24xi32>
    %8 = vector.shape_cast %7 : vector<8x8x24xi32> to vector<64x24xi32>
    %c8_i32 = arith.constant 8 : i32
    %9 = vector.broadcast %c8_i32 : i32 to vector<64x24xi32>
    %10 = arith.cmpi sge, %6, %9 : vector<64x24xi32>
    %c56_i32 = arith.constant 56 : i32
    %11 = vector.broadcast %c56_i32 : i32 to vector<64x24xi32>
    %12 = arith.cmpi slt, %6, %11 : vector<64x24xi32>
    %c1_i32 = arith.constant 1 : i32
    %13 = vector.broadcast %c1_i32 : i32 to vector<64x24xi32>
    %14 = arith.cmpi sge, %8, %13 : vector<64x24xi32>
    %c6_i32 = arith.constant 6 : i32
    %15 = vector.broadcast %c6_i32 : i32 to vector<64x24xi32>
    %16 = arith.cmpi sle, %8, %15 : vector<64x24xi32>
    %cst_3 = arith.constant 0.000000e+00 : f32
    %17 = vector.broadcast %cst_3 : f32 to vector<16x24xf32>
    %18 = tpu.concatenate %17, %3, %17 in 0 : vector<16x24xf32>, vector<64x24xf32>, vector<16x24xf32> -> vector<96x24xf32>
    %cst_4 = arith.constant 0.000000e+00 : f32
    %19 = vector.broadcast %cst_4 : f32 to vector<64x24xf32>
    %20 = vector.extract_strided_slice %18 {offsets = [7, 0], sizes = [64, 24], strides = [1, 1]} : vector<96x24xf32> to vector<64x24xf32>
    %21 = arith.andi %10, %14 : vector<64x24xi1>
    %cst_5 = arith.constant 0.000000e+00 : f32
    %22 = vector.broadcast %cst_5 : f32 to vector<64x24xf32>
    %23 = arith.select %21, %20, %22 : vector<64x24xi1>, vector<64x24xf32>
    %c0_6 = arith.constant 0 : index
    %c0_7 = arith.constant 0 : index
    %24 = vector.load %arg3[%c0_6, %c0_7] : memref<9x24xf32, #tpu.memory_space<vmem>>, vector<1x24xf32>
    %25 = vector.broadcast %24 : vector<1x24xf32> to vector<64x24xf32>
    %26 = arith.mulf %23, %25 : vector<64x24xf32>
    %27 = arith.addf %19, %26 : vector<64x24xf32>
    %28 = vector.extract_strided_slice %18 {offsets = [8, 0], sizes = [64, 24], strides = [1, 1]} : vector<96x24xf32> to vector<64x24xf32>
    %cst_8 = arith.constant 0.000000e+00 : f32
    %29 = vector.broadcast %cst_8 : f32 to vector<64x24xf32>
    %30 = arith.select %10, %28, %29 : vector<64x24xi1>, vector<64x24xf32>
    %c1 = arith.constant 1 : index
    %c0_9 = arith.constant 0 : index
    %31 = vector.load %arg3[%c1, %c0_9] : memref<9x24xf32, #tpu.memory_space<vmem>>, vector<1x24xf32>
    %32 = vector.broadcast %31 : vector<1x24xf32> to vector<64x24xf32>
    %33 = arith.mulf %30, %32 : vector<64x24xf32>
    %34 = arith.addf %27, %33 : vector<64x24xf32>
    %35 = vector.extract_strided_slice %18 {offsets = [9, 0], sizes = [64, 24], strides = [1, 1]} : vector<96x24xf32> to vector<64x24xf32>
    %36 = arith.andi %10, %16 : vector<64x24xi1>
    %cst_10 = arith.constant 0.000000e+00 : f32
    %37 = vector.broadcast %cst_10 : f32 to vector<64x24xf32>
    %38 = arith.select %36, %35, %37 : vector<64x24xi1>, vector<64x24xf32>
    %c2 = arith.constant 2 : index
    %c0_11 = arith.constant 0 : index
    %39 = vector.load %arg3[%c2, %c0_11] : memref<9x24xf32, #tpu.memory_space<vmem>>, vector<1x24xf32>
    %40 = vector.broadcast %39 : vector<1x24xf32> to vector<64x24xf32>
    %41 = arith.mulf %38, %40 : vector<64x24xf32>
    %42 = arith.addf %34, %41 : vector<64x24xf32>
    %43 = vector.extract_strided_slice %18 {offsets = [15, 0], sizes = [64, 24], strides = [1, 1]} : vector<96x24xf32> to vector<64x24xf32>
    %cst_12 = arith.constant 0.000000e+00 : f32
    %44 = vector.broadcast %cst_12 : f32 to vector<64x24xf32>
    %45 = arith.select %14, %43, %44 : vector<64x24xi1>, vector<64x24xf32>
    %c3 = arith.constant 3 : index
    %c0_13 = arith.constant 0 : index
    %46 = vector.load %arg3[%c3, %c0_13] : memref<9x24xf32, #tpu.memory_space<vmem>>, vector<1x24xf32>
    %47 = vector.broadcast %46 : vector<1x24xf32> to vector<64x24xf32>
    %48 = arith.mulf %45, %47 : vector<64x24xf32>
    %49 = arith.addf %42, %48 : vector<64x24xf32>
    %50 = vector.extract_strided_slice %18 {offsets = [16, 0], sizes = [64, 24], strides = [1, 1]} : vector<96x24xf32> to vector<64x24xf32>
    %c4 = arith.constant 4 : index
    %c0_14 = arith.constant 0 : index
    %51 = vector.load %arg3[%c4, %c0_14] : memref<9x24xf32, #tpu.memory_space<vmem>>, vector<1x24xf32>
    %52 = vector.broadcast %51 : vector<1x24xf32> to vector<64x24xf32>
    %53 = arith.mulf %50, %52 : vector<64x24xf32>
    %54 = arith.addf %49, %53 : vector<64x24xf32>
    %55 = vector.extract_strided_slice %18 {offsets = [17, 0], sizes = [64, 24], strides = [1, 1]} : vector<96x24xf32> to vector<64x24xf32>
    %cst_15 = arith.constant 0.000000e+00 : f32
    %56 = vector.broadcast %cst_15 : f32 to vector<64x24xf32>
    %57 = arith.select %16, %55, %56 : vector<64x24xi1>, vector<64x24xf32>
    %c5 = arith.constant 5 : index
    %c0_16 = arith.constant 0 : index
    %58 = vector.load %arg3[%c5, %c0_16] : memref<9x24xf32, #tpu.memory_space<vmem>>, vector<1x24xf32>
    %59 = vector.broadcast %58 : vector<1x24xf32> to vector<64x24xf32>
    %60 = arith.mulf %57, %59 : vector<64x24xf32>
    %61 = arith.addf %54, %60 : vector<64x24xf32>
    %62 = vector.extract_strided_slice %18 {offsets = [23, 0], sizes = [64, 24], strides = [1, 1]} : vector<96x24xf32> to vector<64x24xf32>
    %63 = arith.andi %12, %14 : vector<64x24xi1>
    %cst_17 = arith.constant 0.000000e+00 : f32
    %64 = vector.broadcast %cst_17 : f32 to vector<64x24xf32>
    %65 = arith.select %63, %62, %64 : vector<64x24xi1>, vector<64x24xf32>
    %c6 = arith.constant 6 : index
    %c0_18 = arith.constant 0 : index
    %66 = vector.load %arg3[%c6, %c0_18] : memref<9x24xf32, #tpu.memory_space<vmem>>, vector<1x24xf32>
    %67 = vector.broadcast %66 : vector<1x24xf32> to vector<64x24xf32>
    %68 = arith.mulf %65, %67 : vector<64x24xf32>
    %69 = arith.addf %61, %68 : vector<64x24xf32>
    %70 = vector.extract_strided_slice %18 {offsets = [24, 0], sizes = [64, 24], strides = [1, 1]} : vector<96x24xf32> to vector<64x24xf32>
    %cst_19 = arith.constant 0.000000e+00 : f32
    %71 = vector.broadcast %cst_19 : f32 to vector<64x24xf32>
    %72 = arith.select %12, %70, %71 : vector<64x24xi1>, vector<64x24xf32>
    %c7 = arith.constant 7 : index
    %c0_20 = arith.constant 0 : index
    %73 = vector.load %arg3[%c7, %c0_20] : memref<9x24xf32, #tpu.memory_space<vmem>>, vector<1x24xf32>
    %74 = vector.broadcast %73 : vector<1x24xf32> to vector<64x24xf32>
    %75 = arith.mulf %72, %74 : vector<64x24xf32>
    %76 = arith.addf %69, %75 : vector<64x24xf32>
    %77 = vector.extract_strided_slice %18 {offsets = [25, 0], sizes = [64, 24], strides = [1, 1]} : vector<96x24xf32> to vector<64x24xf32>
    %78 = arith.andi %12, %16 : vector<64x24xi1>
    %cst_21 = arith.constant 0.000000e+00 : f32
    %79 = vector.broadcast %cst_21 : f32 to vector<64x24xf32>
    %80 = arith.select %78, %77, %79 : vector<64x24xi1>, vector<64x24xf32>
    %c8 = arith.constant 8 : index
    %c0_22 = arith.constant 0 : index
    %81 = vector.load %arg3[%c8, %c0_22] : memref<9x24xf32, #tpu.memory_space<vmem>>, vector<1x24xf32>
    %82 = vector.broadcast %81 : vector<1x24xf32> to vector<64x24xf32>
    %83 = arith.mulf %80, %82 : vector<64x24xf32>
    %84 = arith.addf %76, %83 : vector<64x24xf32>
    %c0_23 = arith.constant 0 : index
    %c0_24 = arith.constant 0 : index
    %85 = vector.load %arg4[%c0_23, %c0_24] : memref<1x24xf32, #tpu.memory_space<vmem>>, vector<1x24xf32>
    %86 = vector.broadcast %85 : vector<1x24xf32> to vector<64x24xf32>
    %87 = arith.addf %84, %86 : vector<64x24xf32>
    %88 = arith.negf %87 : vector<64x24xf32>
    %89 = math.exp %88 : vector<64x24xf32>
    %cst_25 = arith.constant 1.000000e+00 : f32
    %90 = vector.broadcast %cst_25 : f32 to vector<64x24xf32>
    %91 = arith.addf %90, %89 : vector<64x24xf32>
    %92 = arith.divf %90, %91 : vector<64x24xf32>
    %93 = arith.mulf %87, %92 : vector<64x24xf32>
    %c0_26 = arith.constant 0 : index
    %c0_27 = arith.constant 0 : index
    %94 = vector.load %arg5[%c0_26, %c0_27] : memref<1x24xf32, #tpu.memory_space<vmem>>, vector<1x24xf32>
    %95 = vector.broadcast %94 : vector<1x24xf32> to vector<64x24xf32>
    %96 = arith.addf %93, %95 : vector<64x24xf32>
    %97 = arith.truncf %96 : vector<64x24xf32> to vector<64x24xbf16>
    %c0_28 = arith.constant 0 : index
    %c0_29 = arith.constant 0 : index
    %98 = vector.load %arg6[%c0_28, %c0_29] : memref<24x24xbf16, #tpu.memory_space<vmem>>, vector<24x24xbf16>
    %cst_30 = arith.constant dense<0.000000e+00> : vector<64x24xf32>
    %99 = tpu.matmul %97, %98, %cst_30 {dimension_numbers = #tpu.dot_dimension_numbers<[1], [0], [0], [1], [0, 0, 1, 1], [], []>} : vector<64x24xbf16>, vector<24x24xbf16>, vector<64x24xf32> -> vector<64x24xf32>
    %100 = arith.negf %99 : vector<64x24xf32>
    %101 = math.exp %100 : vector<64x24xf32>
    %cst_31 = arith.constant 1.000000e+00 : f32
    %102 = vector.broadcast %cst_31 : f32 to vector<64x24xf32>
    %103 = arith.addf %102, %101 : vector<64x24xf32>
    %104 = arith.divf %102, %103 : vector<64x24xf32>
    %105 = arith.mulf %99, %104 : vector<64x24xf32>
    %106 = arith.truncf %105 : vector<64x24xf32> to vector<64x24xbf16>
    %c0_32 = arith.constant 0 : index
    %c0_33 = arith.constant 0 : index
    %107 = vector.load %arg7[%c0_32, %c0_33] : memref<24x24xbf16, #tpu.memory_space<vmem>>, vector<24x24xbf16>
    %cst_34 = arith.constant dense<0.000000e+00> : vector<64x24xf32>
    %108 = tpu.matmul %106, %107, %cst_34 {dimension_numbers = #tpu.dot_dimension_numbers<[1], [0], [0], [1], [0, 0, 1, 1], [], []>} : vector<64x24xbf16>, vector<24x24xbf16>, vector<64x24xf32> -> vector<64x24xf32>
    %cst_35 = arith.constant dense<0.000000e+00> : vector<64xf32>
    %109 = vector.multi_reduction <add>, %108, %cst_35 [1] : vector<64x24xf32> to vector<64xf32>
    %110 = vector.shape_cast %109 : vector<64xf32> to vector<64x1xf32>
    %cst_36 = arith.constant 2.400000e+01 : f32
    %111 = vector.broadcast %cst_36 : f32 to vector<64x1xf32>
    %112 = arith.divf %110, %111 : vector<64x1xf32>
    %113 = vector.broadcast %112 : vector<64x1xf32> to vector<64x24xf32>
    %114 = arith.subf %108, %113 : vector<64x24xf32>
    %115 = arith.mulf %114, %114 : vector<64x24xf32>
    %cst_37 = arith.constant dense<0.000000e+00> : vector<64xf32>
    %116 = vector.multi_reduction <add>, %115, %cst_37 [1] : vector<64x24xf32> to vector<64xf32>
    %117 = vector.shape_cast %116 : vector<64xf32> to vector<64x1xf32>
    %cst_38 = arith.constant 2.400000e+01 : f32
    %118 = vector.broadcast %cst_38 : f32 to vector<64x1xf32>
    %119 = arith.divf %117, %118 : vector<64x1xf32>
    %120 = vector.broadcast %112 : vector<64x1xf32> to vector<64x24xf32>
    %121 = arith.subf %108, %120 : vector<64x24xf32>
    %cst_39 = arith.constant 9.99999974E-6 : f32
    %122 = vector.broadcast %cst_39 : f32 to vector<64x1xf32>
    %123 = arith.addf %119, %122 : vector<64x1xf32>
    %124 = math.rsqrt %123 : vector<64x1xf32>
    %125 = vector.broadcast %124 : vector<64x1xf32> to vector<64x24xf32>
    %126 = arith.mulf %121, %125 : vector<64x24xf32>
    %c0_40 = arith.constant 0 : index
    %c0_41 = arith.constant 0 : index
    %127 = vector.load %arg8[%c0_40, %c0_41] : memref<1x24xf32, #tpu.memory_space<vmem>>, vector<1x24xf32>
    %128 = vector.broadcast %127 : vector<1x24xf32> to vector<64x24xf32>
    %129 = arith.mulf %126, %128 : vector<64x24xf32>
    %c0_42 = arith.constant 0 : index
    %c0_43 = arith.constant 0 : index
    %130 = vector.load %arg9[%c0_42, %c0_43] : memref<1x24xf32, #tpu.memory_space<vmem>>, vector<1x24xf32>
    %131 = vector.broadcast %130 : vector<1x24xf32> to vector<64x24xf32>
    %132 = arith.addf %129, %131 : vector<64x24xf32>
    %133 = arith.negf %4 : vector<64x24xf32>
    %134 = math.exp %133 : vector<64x24xf32>
    %cst_44 = arith.constant 1.000000e+00 : f32
    %135 = vector.broadcast %cst_44 : f32 to vector<64x24xf32>
    %136 = arith.addf %135, %134 : vector<64x24xf32>
    %137 = arith.divf %135, %136 : vector<64x24xf32>
    %138 = arith.mulf %4, %137 : vector<64x24xf32>
    %139 = arith.mulf %132, %138 : vector<64x24xf32>
    %140 = arith.truncf %139 : vector<64x24xf32> to vector<64x24xbf16>
    %c0_45 = arith.constant 0 : index
    %c0_46 = arith.constant 0 : index
    %141 = vector.load %arg10[%c0_45, %c0_46] : memref<24x16xbf16, #tpu.memory_space<vmem>>, vector<24x16xbf16>
    %cst_47 = arith.constant dense<0.000000e+00> : vector<64x16xf32>
    %142 = tpu.matmul %140, %141, %cst_47 {dimension_numbers = #tpu.dot_dimension_numbers<[1], [0], [0], [1], [0, 0, 1, 1], [], []>} : vector<64x24xbf16>, vector<24x16xbf16>, vector<64x16xf32> -> vector<64x16xf32>
    %c0_48 = arith.constant 0 : index
    %c0_49 = arith.constant 0 : index
    %143 = vector.load %arg11[%c0_48, %c0_49] : memref<64x16xf32, #tpu.memory_space<vmem>>, vector<64x16xf32>
    tpu.vector_store %arg11[%c0_48, %c0_49], %142 {strides = array<i32>} : memref<64x16xf32, #tpu.memory_space<vmem>>, vector<64x16xf32>,
    return
  }
  func.func @transform_0(%arg0: i32) -> (i32, i32) {
    %c0_i32 = arith.constant 0 : i32
    %c0_i32_0 = arith.constant 0 : i32
    return %arg0, %c0_i32 : i32, i32
  }
  func.func @transform_1(%arg0: i32) -> (i32, i32) {
    %c0_i32 = arith.constant 0 : i32
    %c0_i32_0 = arith.constant 0 : i32
    %c0_i32_1 = arith.constant 0 : i32
    return %c0_i32, %c0_i32_0 : i32, i32
  }
  func.func @transform_2(%arg0: i32) -> (i32, i32) {
    %c0_i32 = arith.constant 0 : i32
    %c0_i32_0 = arith.constant 0 : i32
    %c0_i32_1 = arith.constant 0 : i32
    return %c0_i32, %c0_i32_0 : i32, i32
  }
  func.func @transform_3(%arg0: i32) -> (i32, i32) {
    %c0_i32 = arith.constant 0 : i32
    %c0_i32_0 = arith.constant 0 : i32
    %c0_i32_1 = arith.constant 0 : i32
    return %c0_i32, %c0_i32_0 : i32, i32
  }
  func.func @transform_4(%arg0: i32) -> (i32, i32) {
    %c0_i32 = arith.constant 0 : i32
    %c0_i32_0 = arith.constant 0 : i32
    %c0_i32_1 = arith.constant 0 : i32
    return %c0_i32, %c0_i32_0 : i32, i32
  }
  func.func @transform_5(%arg0: i32) -> (i32, i32) {
    %c0_i32 = arith.constant 0 : i32
    %c0_i32_0 = arith.constant 0 : i32
    %c0_i32_1 = arith.constant 0 : i32
    return %c0_i32, %c0_i32_0 : i32, i32
  }
  func.func @transform_6(%arg0: i32) -> (i32, i32) {
    %c0_i32 = arith.constant 0 : i32
    %c0_i32_0 = arith.constant 0 : i32
    %c0_i32_1 = arith.constant 0 : i32
    return %c0_i32, %c0_i32_0 : i32, i32
  }
  func.func @transform_7(%arg0: i32) -> (i32, i32) {
    %c0_i32 = arith.constant 0 : i32
    %c0_i32_0 = arith.constant 0 : i32
    %c0_i32_1 = arith.constant 0 : i32
    return %c0_i32, %c0_i32_0 : i32, i32
  }
  func.func @transform_8(%arg0: i32) -> (i32, i32) {
    %c0_i32 = arith.constant 0 : i32
    %c0_i32_0 = arith.constant 0 : i32
    %c0_i32_1 = arith.constant 0 : i32
    return %c0_i32, %c0_i32_0 : i32, i32
  }
  func.func @transform_9(%arg0: i32) -> (i32, i32) {
    %c0_i32 = arith.constant 0 : i32
    %c0_i32_0 = arith.constant 0 : i32
    %c0_i32_1 = arith.constant 0 : i32
    return %c0_i32, %c0_i32_0 : i32, i32
  }
  func.func @transform_10(%arg0: i32) -> (i32, i32) {
    %c0_i32 = arith.constant 0 : i32
    %c0_i32_0 = arith.constant 0 : i32
    return %arg0, %c0_i32 : i32, i32
  }
}

</mosaic_0001>

<bundles_post_ra>
// kernel: tpu_custom_call.1
= control target key start
LH: loop header
LB: loop body
LE: loop exit
PB: predicated region body
PF: predicated region fallthrough
CT: control target
= control target key end

     0   :  { %s1929_s13 = smov 0   ;;  %s2472_s0 = inlined_call_operand.vmem [shape: bf16[128,16], index: 0, kind: input, shape index: {}]   ;;  %s2473_s1 = inlined_call_operand.vmem [shape: bf16[16,48], index: 1, kind: input, shape index: {}]   ;;  %s2474_s2 = inlined_call_operand.vmem [shape: f32[9,24], index: 2, kind: input, shape index: {}]   ;;  %s2475_s3 = inlined_call_operand.vmem [shape: f32[1,24], index: 3, kind: input, shape index: {}]   ;;  %s2476_s4 = inlined_call_operand.vmem [shape: f32[1,24], index: 4, kind: input, shape index: {}]   ;;  %s2477_s5 = inlined_call_operand.vmem [shape: bf16[24,24], index: 5, kind: input, shape index: {}]   ;;  %s2478_s6 = inlined_call_operand.vmem [shape: bf16[24,24], index: 6, kind: input, shape index: {}]   ;;  %s2479_s7 = inlined_call_operand.vmem [shape: f32[1,24], index: 7, kind: input, shape index: {}]   ;;  %s2480_s8 = inlined_call_operand.vmem [shape: f32[1,24], index: 8, kind: input, shape index: {}]   ;;  %s2481_s9 = inlined_call_operand.vmem [shape: bf16[24,16], index: 9, kind: input, shape index: {}]   ;;  %s2482_s10 = inlined_call_operand.vmem [shape: f32[128,16], index: 10, kind: output, shape index: {}]  }
   0x1 LB: > { %s1584_s14 = sadd.s32 4294967295, %s1870_s13   ;;  %p1588_p0 = scmp.ge.s32.totalorder %s1870_s13, 1  ;;  %s1870_s13 = sphi %s1929_s13, %s20_s13  }
   0x2   : > { %p313_p1 = scmp.lt.s32.totalorder %s1870_s13, 3 }
   0x4   : > { %p314_p2 = pnand %p1588_p0, %p313_p1 }
   0x6   : > { %317 = sbr.rel (%p314_p2) target bundleno = 1315 (0x523), region = 60 }
   0xb   : > { %v1741_v0 = vld [vmem:[%s2473_s1] sm:$0xff]   ;;  %s1589_s17 = sshll.u32 %s1584_s14, 3  ;;  %vm400_vm0 = vcmask 130048   ;;  %v1746_v5 = vld [vmem:[%s2477_s5 + $0x8] ss:$0 sps:$4 sm:$0xff]   ;;  %vm972_vm1 = vcmask 1043456   ;;  %v478_v8 = vlaneseq }
   0xc   : > { %p352_p3 = scmp.lt.s32.totalorder %s1589_s17, 15  ;;  %1682 = vmatprep.subr.bf16.mxu0 %v1741_v0  ;;  %v1747_v6 = vld [vmem:[%s2477_s5] sm:$0xff]   ;;  %1728 = vmatprep.subr.msk.bf16.mxu1 %vm972_vm1, %v1746_v5  ;;  %v974_v7 = vsel %vm972_vm1, %v1746_v5, 0  ;;  %v1872_v16 = vmov 0.0   ;;  %vm521_vm2 = vcmask 1040384   ;;  %vm612_vm4 = vcmask 1046528  }
   0xd   : > { %1683 = vmatpush3.bf16.msra.mxu0 %v1741_v0  ;;  %1693 = vmatpush3.bf16.msra.mxu1 %v974_v7  ;;  %v1961_v9 = vld [vmem:[%s2474_s2] ss:$0 sm:$0xff]  ;;  %v1966_v10 = vld [vmem:[%s2474_s2 + $0x1] ss:$0 sm:$0xff]  ;;  %v1970_v13 = vshrl.u32 %v478_v8, 7  ;;  %v522_v17 = vrot.slane %v1872_v16, 7 }
   0xe   : > { %s2526_s17 = smov (!%p352_p3, %s1589_s17), 15  ;;  %1694 = vmatprep.subr.bf16.mxu1 %v1747_v6  ;;  %v559_v11 = vmul.f32 0.0, %v1961_v9  ;;  %v587_v12 = vmul.f32 0.0, %v1966_v10  ;;  %v1975_v14 = vld [vmem:[%s2474_s2 + $0x2] ss:$0 sm:$0xff]  ;;  %v613_v34 = vrot.slane %v1872_v16, 1 }
   0xf   : > { %s1590_s18 = sshll.u32 %s2526_s17, 2  ;;  %v651_v20 = vmul.f32 0.0, %v1975_v14  ;;  %vm503_vm3 = vcmp.ge.s32.totalorder %v1970_v13, 1  ;;  %v1987_v22 = vld [vmem:[%s2474_s2 + $0x3] ss:$0 sm:$0xff]  ;;  %vm504_vm5 = vcmp.le.s32.totalorder %v1970_v13, 6 }
  0x10   : > { %s355_s21 = scalar_lea.vmem %s2472_s0, %s1590_s18  ;;  %v595_v19 = vadd.f32 %v587_v12, %v559_v11  ;;  %v1997_v27 = vld [vmem:[%s2474_s2 + $0x4] ss:$0 sm:$0xff]  ;;  %v2004_v30 = vld [vmem:[%s2474_s2 + $0x7] ss:$0 sm:$0xff]  ;;  %v2015_v35 = vld [vmem:[%s2474_s2 + $0x6] ss:$0 sm:$0xff] }
  0x11   : > { %v1742_v1 = vld [vmem:[%s355_s21] sm:$0xff]   ;;  %v1743_v2 = vld [vmem:[%s355_s21 + $0x8] sm:$0xff]   ;;  %v1744_v3 = vld [vmem:[%s355_s21 + $0x10] sm:$0xff]   ;;  %1695 = vmatpush3.bf16.msra.mxu1 %v1747_v6  ;;  %v2027_v39 = vmul.f32 0.0, %v2015_v35  ;;  %v2030_v40 = vmul.f32 0.0, %v2004_v30  ;;  %vm959_vm6 = vcmask 195584  }
  0x12   : > { %1684 = vmatprep.mubr.msk.bf16.mxu0 %vm400_vm0, %v1742_v1  ;;  %v1745_v4 = vld [vmem:[%s355_s21 + $0x18] sm:$0xff]   ;;  %v659_v29 = vadd.f32 %v651_v20, %v595_v19  ;;  %v2020_v36 = vld [vmem:[%s2474_s2 + $0x8] ss:$0 sm:$0xff]  ;;  %s1873_s15 = smov 104   ;;  %s1592_s25 = sshll.u32 %s2526_s17, 3 }
  0x13   : > { %1685 = vmatmul.mubr.msk.bf16.vlgmr.msra.gmra.mxu0 %vm400_vm0, %v1743_v2  ;;  %2502 = vst [vmem:[#allocation5_spill] sm:$0xff] %v2030_v40  ;;  %v2033_v41 = vmul.f32 0.0, %v2020_v36  ;;  %s361_s28 = scalar_lea.vmem %s2482_s10, %s1592_s25 }
  0x14   : > { %1688 = vmatprep.mubr.msk.bf16.mxu0 %vm400_vm0, %v1744_v3 }
  0x15   : > { %2503 = vst [vmem:[#allocation6_spill] sm:$0xff] %v2033_v41 }
  0x1b   : > { %1689 = vmatmul.mubr.msk.bf16.gmra.mxu0 %vm400_vm0, %v1745_v4 }
  0xd3   : > { %v1977_v15 = vpop.f32.mrf.mxu0 }
  0xd4   : > { %v2485_v24 = vrot.slane %v1977_v15, 7  ;;  %v2037_v42 = vmul.f32 %v1977_v15, %v1966_v10  ;;  %v2042_v44 = vmul.f32 %v1977_v15, %v1997_v27  ;;  %v2046_v45 = vmul.f32 %v1977_v15, %v2004_v30 }
  0xd5   : > { %v1979_v18 = vpop.f32.mrf.mxu0  ;;  %v2508_v41 = vrot.slane %v1977_v15, 7 }
  0xd6   : > { %2499 = vst [vmem:[#allocation2_spill] sm:$0xff] %v1979_v18  ;;  %v524_v21 = vrot.slane %v1979_v18, 7  ;;  %v588_v47 = vmul.f32 %v1966_v10, %v1979_v18  ;;  %v704_v53 = vmul.f32 %v1997_v27, %v1979_v18  ;;  %v2511_v40 = vrot.slane %v1979_v18, 1 }
  0xd7   : > { %v1989_v23 = vpop.f32.mrf.mxu0 }
  0xd8   : > { %2500 = vst [vmem:[#allocation3_spill] sm:$0xff] %v1989_v23  ;;  %v525_v25 = vsel %vm521_vm2, %v522_v17, %v524_v21  ;;  %v530_v26 = vrot.slane %v1989_v23, 7  ;;  %v591_v54 = vmul.f32 %v1989_v23, %v1966_v10  ;;  %v2483_v55 = vrot.slane %v1989_v23, 1 }
  0xd9   : > { %v547_v28 = vsel %vm503_vm3, %v525_v25, 0.0  ;;  %v2006_v31 = vpop.f32.mrf.mxu0  ;;  %v2068_v56 = vmul.f32 %v1989_v23, %v1997_v27  ;;  %v2072_v57 = vmul.f32 %v1989_v23, %v2004_v30 }
  0xda   : > { %v683_v32 = vmul.f32 %v1987_v22, %v547_v28  ;;  %v531_v33 = vsel %vm521_vm2, %v2485_v24, %v530_v26  ;;  %v2484_v37 = vrot.slane %v2006_v31, 7  ;;  %v560_v46 = vmul.f32 %v1961_v9, %v547_v28 }
  0xdb   : > { %v2023_v38 = vpop.f32.mrf.mxu0  ;;  %v2053_v48 = vsel %vm503_vm3, %v531_v33, 0.0  ;;  %v589_v58 = vmul.f32 %v1966_v10, %v2006_v31  ;;  %v2095_v5 = vmul.f32 %v1997_v27, %v2006_v31 }
  0xdc   : > { %2501 = vst [vmem:[#allocation4_spill] sm:$0xff] %v2023_v38  ;;  %v527_v49 = vsel %vm521_vm2, %v524_v21, %v2484_v37  ;;  %v691_v52 = vadd.f32 %v683_v32, %v659_v29  ;;  %v563_v60 = vmul.f32 %v1961_v9, %v2053_v48  ;;  %v2086_v0 = vadd.f32 %v588_v47, %v560_v46 }
  0xdd   : > { %v2058_v50 = vpop.f32.mrf.mxu0  ;;  %v2082_v61 = vsel %vm503_vm3, %v527_v49, 0.0  ;;  %v536_v1 = vrot.slane %v2023_v38, 7  ;;  %v626_v2 = vrot.slane %v2023_v38, 1  ;;  %v594_v19 = vmul.f32 %v2023_v38, %v1966_v10 }
  0xde   : > { %2504 = vst [vmem:[#allocation7_spill] sm:$0xff] %v2058_v50  ;;  %v532_v63 = vrot.slane %v2058_v50, 7  ;;  %v622_v3 = vrot.slane %v2058_v50, 1  ;;  %v2091_v4 = vadd.f32 %v704_v53, %v691_v52  ;;  %v561_v8 = vmul.f32 %v1961_v9, %v2082_v61 }
  0xdf   : > { %v2076_v59 = vpop.f32.mrf.mxu0  ;;  %v599_v17 = vadd.f32 %v591_v54, %v563_v60  ;;  %v2113_v20 = vmul.f32 %v2023_v38, %v1997_v27  ;;  %v2127_v32 = vmul.f32 %v2023_v38, %v2004_v30  ;;  %v592_v52 = vmul.f32 %v1966_v10, %v2058_v50 }
  0xe0   : > { %2505 = vst [vmem:[#allocation8_spill] sm:$0xff] %v2076_v59  ;;  %v533_v6 = vsel %vm521_vm2, %v530_v26, %v532_v63  ;;  %v628_v7 = vrot.slane %v2076_v59, 1  ;;  %v623_v12 = vsel %vm612_vm4, %v2483_v55, %v622_v3  ;;  %v667_v16 = vrot.slane %v2076_v59, 7 }
  0xe1   : > { %v2103_v11 = vsel %vm503_vm3, %v533_v6, 0.0  ;;  %v2117_v21 = vsel %vm504_vm5, %v623_v12, 0.0  ;;  %v2136_v49 = vadd.f32 %v589_v58, %v561_v8  ;;  %v708_v54 = vmul.f32 %v1997_v27, %v2058_v50  ;;  %v2142_v60 = vpop.f32.mrf.mxu0  ;;  %v2149_v12 = vld [vmem:[%s2474_s2 + $0x5] ss:$0 sm:$0xff] }
  0xe2   : > { %v564_v25 = vmul.f32 %v1961_v9, %v2103_v11  ;;  %v655_v26 = vmul.f32 %v1975_v14, %v2117_v21  ;;  %v629_v28 = vsel %vm612_vm4, %v626_v2, %v628_v7  ;;  %v668_v29 = vsel %vm521_vm2, %v536_v1, %v667_v16  ;;  %2506 = vst [vmem:[#allocation9_spill] sm:$0xff] %v2142_v60 }
  0xe3   : > { %v2131_v33 = vsel %vm504_vm5, %v629_v28, 0.0  ;;  %v677_v46 = vsel %vm503_vm3, %v668_v29, 0.0  ;;  %v720_v47 = vsel %vm612_vm4, %v628_v7, %v613_v34  ;;  %v687_v6 = vmul.f32 %v1987_v22, %v2103_v11 }
  0xe4   : > { %v663_v53 = vadd.f32 %v655_v26, %v599_v17  ;;  %v2153_v34 = vmul.f32 %v2004_v30, %v2058_v50  ;;  %v2157_v58 = vmul.f32 %v2076_v59, %v1997_v27  ;;  %v2161_v7 = vsel %vm504_vm5, %v720_v47, 0.0 }
  0xe5   : > { %2507 = vst [vmem:[#allocation10_spill] sm:$0xff] %v2161_v7  ;;  %v600_v8 = vadd.f32 %v592_v52, %v564_v25  ;;  %v2165_v16 = vmul.f32 %v2149_v12, %v2117_v21  ;;  %v658_v17 = vmul.f32 %v1975_v14, %v2131_v33  ;;  %v2170_v26 = vmul.f32 %v1987_v22, %v677_v46 }
  0xe6   : > { %v2174_v28 = vmul.f32 %v2149_v12, %v2131_v33  ;;  %v2177_v29 = vmul.f32 %v2015_v35, %v677_v46  ;;  %v534_v47 = vrot.slane %v2142_v60, 7  ;;  %v624_v25 = vrot.slane %v2142_v60, 1 }
  0xe7   : > { %v695_v52 = vadd.f32 %v687_v6, %v663_v53  ;;  %v2183_v55 = vmul.f32 %v2149_v12, %v2161_v7  ;;  %v2187_v43 = vmul.f32 %v2076_v59, %v2004_v30  ;;  %v593_v51 = vmul.f32 %v1966_v10, %v2142_v60 }
  0xe8   : > { %v535_v62 = vsel %vm521_vm2, %v532_v63, %v534_v47  ;;  %v537_v46 = vsel %vm521_vm2, %v534_v47, %v536_v1  ;;  %v625_v37 = vsel %vm612_vm4, %v622_v3, %v624_v25  ;;  %v627_v24 = vsel %vm612_vm4, %v624_v25, %v626_v2 }
  0xe9   : > { %v2197_v53 = vsel %vm503_vm3, %v535_v62, 0.0  ;;  %v2201_v6 = vsel %vm503_vm3, %v537_v46, 0.0  ;;  %v2205_v59 = vsel %vm504_vm5, %v625_v37, 0.0  ;;  %v2209_v10 = vsel %vm504_vm5, %v627_v24, 0.0 }
  0xea   : > { %v565_v63 = vmul.f32 %v1961_v9, %v2197_v53  ;;  %v566_v1 = vmul.f32 %v1961_v9, %v2201_v6  ;;  %v656_v62 = vmul.f32 %v1975_v14, %v2205_v59  ;;  %v709_v2 = vmul.f32 %v1997_v27, %v2142_v60 }
  0xeb   : > { %v716_v3 = vadd.f32 %v708_v54, %v695_v52  ;;  %v657_v37 = vmul.f32 %v1975_v14, %v2209_v10  ;;  %v688_v24 = vmul.f32 %v1987_v22, %v2197_v53  ;;  %v2225_v47 = vmul.f32 %v2004_v30, %v2142_v60 }
  0xec   : > { %v601_v25 = vadd.f32 %v593_v51, %v565_v63  ;;  %v602_v46 = vadd.f32 %v594_v19, %v566_v1  ;;  %v664_v38 = vadd.f32 %v656_v62, %v600_v8  ;;  %v689_v50 = vmul.f32 %v1987_v22, %v2201_v6 }
  0xed   : > { %v2509_v27 = vrot.slane %v2006_v31, 7  ;;  %v2510_v52 = vrot.slane %v2006_v31, 1  ;;  %v2512_v60 = vrot.slane %v1977_v15, 1  ;;  %v2514_v8 = vrot.slane %v1989_v23, 1 }
  0xee   : > { %v665_v62 = vadd.f32 %v657_v37, %v601_v25  ;;  %v666_v25 = vadd.f32 %v658_v17, %v602_v46  ;;  %v684_v13 = vmul.f32 %v1987_v22, %v2082_v61  ;;  %v686_v23 = vmul.f32 %v1987_v22, %v2053_v48 }
  0xef   : > { %v529_v54 = vsel %vm521_vm2, %v2509_v27, %v2508_v41  ;;  %v617_v7 = vsel %vm612_vm4, %v2511_v40, %v2510_v52  ;;  %v2513_v51 = vmov %v2510_v52  ;;  %v2515_v63 = vmov %v2512_v60 }
  0xf0   : > { %v619_v19 = vsel %vm612_vm4, %v2513_v51, %v2512_v60  ;;  %v621_v1 = vsel %vm612_vm4, %v2515_v63, %v2514_v8  ;;  %v696_v41 = vadd.f32 %v688_v24, %v664_v38  ;;  %v739_v27 = vmul.f32 %v2149_v12, %v2205_v59 }
  0xf1   : > { %v549_v40 = vsel %vm503_vm3, %v529_v54, 0.0  ;;  %v639_v18 = vsel %vm504_vm5, %v617_v7, 0.0  ;;  %v640_v60 = vsel %vm504_vm5, %v619_v19, 0.0  ;;  %v641_v51 = vsel %vm504_vm5, %v621_v1, 0.0 }
  0xf2   : > { %v562_v52 = vmul.f32 %v1961_v9, %v549_v40  ;;  %v717_v8 = vadd.f32 %v709_v2, %v696_v41  ;;  %v740_v38 = vmul.f32 %v2149_v12, %v2209_v10  ;;  %v652_v37 = vmul.f32 %v1975_v14, %v639_v18 }
  0xf3   : > { %v653_v24 = vmul.f32 %v1975_v14, %v640_v60  ;;  %v697_v54 = vadd.f32 %v689_v50, %v665_v62  ;;  %v654_v7 = vmul.f32 %v1975_v14, %v641_v51  ;;  %v685_v2 = vmul.f32 %v1987_v22, %v549_v40 }
  0xf4   : > { %v598_v9 = vadd.f32 %v2037_v42, %v562_v52  ;;  %v660_v63 = vadd.f32 %v652_v37, %v2086_v0  ;;  %v748_v1 = vadd.f32 %v740_v38, %v717_v8  ;;  %v735_v50 = vmul.f32 %v2149_v12, %v639_v18 }
  0xf5   : > { %v661_v19 = vadd.f32 %v653_v24, %v2136_v49  ;;  %v736_v14 = vmul.f32 %v2149_v12, %v640_v60  ;;  %v737_v0 = vmul.f32 %v2149_v12, %v641_v51  ;;  %v774_v62 = vmul.f32 %v2015_v35, %v2082_v61 }
  0xf6   : > { %v662_v41 = vadd.f32 %v654_v7, %v598_v9  ;;  %v692_v17 = vadd.f32 %v684_v13, %v660_v63  ;;  %v743_v49 = vadd.f32 %v735_v50, %v2091_v4  ;;  %v775_v52 = vmul.f32 %v2015_v35, %v549_v40 }
  0xf7   : > { %v693_v42 = vadd.f32 %v685_v2, %v661_v19  ;;  %v802_v18 = vmul.f32 %v2004_v30, %v2006_v31  ;;  %v841_v38 = vmul.f32 %v2020_v36, %v640_v60  ;;  %v776_v4 = vmul.f32 %v2015_v35, %v2053_v48  ;;  %v1611_v48 = vld [vmem:[%s2475_s3] ss:$0 sm:$0xff] }
  0xf8   : > { %v694_v46 = vadd.f32 %v686_v23, %v662_v41  ;;  %v713_v8 = vadd.f32 %v2095_v5, %v692_v17  ;;  %v782_v12 = vadd.f32 %v774_v62, %v743_v49  ;;  %v842_v23 = vmul.f32 %v2020_v36, %v641_v51  ;;  %v2516_v62 = vld [vmem:[#allocation10_spill] sm:$0xff] }
  0xf9   : > { %v714_v22 = vadd.f32 %v2042_v44, %v693_v42  ;;  %v777_v5 = vmul.f32 %v2015_v35, %v2103_v11  ;;  %v843_v44 = vmul.f32 %v2020_v36, %v2117_v21  ;;  %v747_v60 = vadd.f32 %v739_v27, %v716_v3 }
  0xfa   : > { %v715_v37 = vadd.f32 %v2068_v56, %v694_v46  ;;  %v744_v61 = vadd.f32 %v736_v14, %v713_v8  ;;  %v810_v40 = vadd.f32 %v802_v18, %v782_v12  ;;  %v844_v56 = vmul.f32 %v2020_v36, %v2205_v59 }
  0xfb   : > { %v745_v24 = vadd.f32 %v737_v0, %v714_v22  ;;  %v778_v7 = vmul.f32 %v2015_v35, %v2197_v53  ;;  %v779_v11 = vmul.f32 %v2015_v35, %v2201_v6  ;;  %v846_v59 = vmul.f32 %v2020_v36, %v2131_v33 }
  0xfc   : > { %v746_v30 = vadd.f32 %v2165_v16, %v715_v37  ;;  %v783_v9 = vadd.f32 %v775_v52, %v744_v61  ;;  %v849_v21 = vadd.f32 %v841_v38, %v810_v40  ;;  %v845_v16 = vmul.f32 %v2020_v36, %v2209_v10  ;;  %v2518_v38 = vld [vmem:[#allocation6_spill] sm:$0xff] }
  0xfd   : > { %v784_v51 = vadd.f32 %v776_v4, %v745_v24  ;;  %v786_v19 = vadd.f32 %v778_v7, %v747_v60  ;;  %v787_v13 = vadd.f32 %v779_v11, %v748_v1  ;;  %v698_v35 = vadd.f32 %v2170_v26, %v666_v25 }
  0xfe   : > { %v785_v63 = vadd.f32 %v777_v5, %v746_v30  ;;  %v811_v3 = vadd.f32 %v2046_v45, %v783_v9  ;;  %v2309_v2 = vadd.f32 %v1611_v48, %v849_v21  ;;  %v718_v6 = vadd.f32 %v2113_v20, %v697_v54 }
  0xff   : > { %v812_v27 = vadd.f32 %v2072_v57, %v784_v51  ;;  %v814_v10 = vadd.f32 %v2225_v47, %v786_v19  ;;  %v815_v33 = vadd.f32 %v2127_v32, %v787_v13  ;;  %v719_v57 = vadd.f32 %v2157_v58, %v698_v35 }
 0x100   : > { %v813_v53 = vadd.f32 %v2153_v34, %v785_v63  ;;  %v850_v41 = vadd.f32 %v842_v23, %v811_v3  ;;  %v1612_v45 = vmul.f32 -1.442695, %v2309_v2  ;;  %v749_v1 = vadd.f32 %v2174_v28, %v718_v6  ;;  %v1620_v3 = vld [vmem:[%s2476_s4] ss:$0 sm:$0xff] }
 0x101   : > { %v851_v50 = vadd.f32 %v843_v44, %v812_v27  ;;  %v853_v34 = vadd.f32 %v845_v16, %v814_v10  ;;  %v854_v0 = vadd.f32 %v846_v59, %v815_v33  ;;  %v750_v20 = vadd.f32 %v2183_v55, %v719_v57  ;;  %v2517_v55 = vld [vmem:[#allocation5_spill] sm:$0xff] }
 0x102   : > { %v852_v17 = vadd.f32 %v844_v56, %v813_v53  ;;  %v865_v42 = vadd.f32 %v1611_v48, %v850_v41  ;;  %1752 = vpow2.f32 %v1612_v45  ;;  %v788_v25 = vadd.f32 %v2177_v29, %v749_v1 }
 0x103   : > { %v866_v14 = vadd.f32 %v1611_v48, %v851_v50  ;;  %v868_v32 = vadd.f32 %v1611_v48, %v853_v34  ;;  %v2321_v46 = vadd.f32 %v1611_v48, %v854_v0  ;;  %v789_v58 = vadd.f32 %v2027_v39, %v750_v20 }
 0x104   : > { %v867_v26 = vadd.f32 %v1611_v48, %v852_v17  ;;  %v1613_v47 = vmul.f32 -1.442695, %v865_v42  ;;  %v816_v28 = vadd.f32 %v2187_v43, %v788_v25  ;;  %v847_v52 = vmul.f32 %v2020_v36, %v2516_v62 }
 0x105   : > { %v1614_v54 = vmul.f32 -1.442695, %v866_v14  ;;  %v1616_v8 = vmul.f32 -1.442695, %v868_v32  ;;  %v1617_v22 = vmul.f32 -1.442695, %v2321_v46  ;;  %v817_v29 = vadd.f32 %v2517_v55, %v789_v58 }
 0x106   : > { %v1615_v49 = vmul.f32 -1.442695, %v867_v26  ;;  %1754 = vpow2.f32 %v1613_v47  ;;  %v855_v18 = vadd.f32 %v847_v52, %v816_v28  ;;  %v1749_v58 = vld [vmem:[%s2478_s6] sm:$0xff]  }
 0x107   : > { %1756 = vpow2.f32 %v1614_v54  ;;  %v856_v37 = vadd.f32 %v2518_v38, %v817_v29 }
 0x108   : > { %1758 = vpow2.f32 %v1615_v49  ;;  %v870_v12 = vadd.f32 %v1611_v48, %v855_v18 }
 0x109   : > { %1760 = vpow2.f32 %v1616_v8  ;;  %v871_v39 = vadd.f32 %v1611_v48, %v856_v37 }
 0x10a   : > { %1762 = vpow2.f32 %v1617_v22  ;;  %v1618_v23 = vmul.f32 -1.442695, %v870_v12 }
 0x10b   : > { %v1619_v43 = vmul.f32 -1.442695, %v871_v39 }
 0x10c   : > { %1764 = vpow2.f32 %v1618_v23 }
 0x10d   : > { %1766 = vpow2.f32 %v1619_v43 }
 0x10f   : > { %v1753_v36 = vpop.eup %1752 }
 0x110   : > { %v896_v4 = vadd.f32 1.0, %v1753_v36 }
 0x112   : > { %1768 = vrcp.f32 %v896_v4 }
 0x113   : > { %v1755_v61 = vpop.eup %1754 }
 0x114   : > { %v1757_v24 = vpop.eup %1756  ;;  %v897_v5 = vadd.f32 1.0, %v1755_v61 }
 0x115   : > { %v1759_v44 = vpop.eup %1758  ;;  %v898_v40 = vadd.f32 1.0, %v1757_v24 }
 0x116   : > { %v1761_v30 = vpop.eup %1760  ;;  %1770 = vrcp.f32 %v897_v5  ;;  %v899_v56 = vadd.f32 1.0, %v1759_v44 }
 0x117   : > { %v1763_v60 = vpop.eup %1762  ;;  %1772 = vrcp.f32 %v898_v40  ;;  %v900_v9 = vadd.f32 1.0, %v1761_v30 }
 0x118   : > { %1774 = vrcp.f32 %v899_v56  ;;  %v901_v48 = vadd.f32 1.0, %v1763_v60 }
 0x119   : > { %1776 = vrcp.f32 %v900_v9  ;;  %v1765_v51 = vpop.eup %1764 }
 0x11a   : > { %1778 = vrcp.f32 %v901_v48  ;;  %v902_v7 = vadd.f32 1.0, %v1765_v51  ;;  %v1767_v11 = vpop.eup %1766 }
 0x11b   : > { %v903_v21 = vadd.f32 1.0, %v1767_v11 }
 0x11c   : > { %1780 = vrcp.f32 %v902_v7 }
 0x11d   : > { %1782 = vrcp.f32 %v903_v21 }
 0x11f   : > { %v1769_v63 = vpop.eup %1768 }
 0x120   : > { %v920_v16 = vmul.f32 %v1769_v63, %v2309_v2 }
 0x122   : > { %v935_v6 = vadd.f32 %v1620_v3, %v920_v16 }
 0x123   : > { %v1771_v59 = vpop.eup %1770 }
 0x124   : > { %v1773_v27 = vpop.eup %1772  ;;  %v921_v19 = vmul.f32 %v1771_v59, %v865_v42 }
 0x125   : > { %v1775_v13 = vpop.eup %1774  ;;  %v922_v53 = vmul.f32 %v1773_v27, %v866_v14 }
 0x126   : > { %v1777_v35 = vpop.eup %1776  ;;  %v936_v41 = vadd.f32 %v1620_v3, %v921_v19  ;;  %v923_v50 = vmul.f32 %v1775_v13, %v867_v26 }
 0x127   : > { %v1779_v10 = vpop.eup %1778  ;;  %v937_v33 = vadd.f32 %v1620_v3, %v922_v53  ;;  %v924_v45 = vmul.f32 %v1777_v35, %v868_v32 }
 0x128   : > { %v943_v17 = vpack.c.bf16 %v936_v41, %v935_v6  ;;  %v938_v57 = vadd.f32 %v1620_v3, %v923_v50  ;;  %v925_v2 = vmul.f32 %v1779_v10, %v2321_v46  ;;  %v1748_v46 = vld [vmem:[%s2478_s6 + $0x8] ss:$0 sps:$4 sm:$0xff]  }
 0x129   : > { %v1781_v1 = vpop.eup %1780  ;;  %v939_v0 = vadd.f32 %v1620_v3, %v924_v45  ;;  %1729 = vmatprep.subr.msk.bf16.mxu0 %vm972_vm1, %v1748_v46  ;;  %v1126_v49 = vsel %vm972_vm1, %v1748_v46, 0 }
 0x12a   : > { %1696 = vmatprep.mubr.msk.bf16.mxu1 %vm959_vm6, %v943_v17  ;;  %v944_v34 = vpack.c.bf16 %v938_v57, %v937_v33  ;;  %v940_v42 = vadd.f32 %v1620_v3, %v925_v2  ;;  %v926_v20 = vmul.f32 %v1781_v1, %v870_v12  ;;  %v1783_v14 = vpop.eup %1782  ;;  %1705 = vmatpush3.bf16.msra.mxu0 %v1126_v49 }
 0x12b   : > { %v927_v26 = vmul.f32 %v1783_v14, %v871_v39  ;;  %1706 = vmatprep.subr.bf16.mxu0 %v1749_v58 }
 0x12c   : > { %1697 = vmatmul.mubr.msk.bf16.vlgmr.msra.gmra.mxu1 %vm959_vm6, %v944_v34  ;;  %v945_v25 = vpack.c.bf16 %v940_v42, %v939_v0  ;;  %v941_v47 = vadd.f32 %v1620_v3, %v926_v20 }
 0x12d   : > { %v942_v54 = vadd.f32 %v1620_v3, %v927_v26 }
 0x12e   : > { %1700 = vmatprep.mubr.msk.bf16.mxu1 %vm959_vm6, %v945_v25  ;;  %1707 = vmatpush3.bf16.msra.mxu0 %v1749_v58 }
 0x12f   : > { %v946_v32 = vpack.c.bf16 %v942_v54, %v941_v47 }
 0x134   : > { %1701 = vmatmul.mubr.msk.bf16.gmra.mxu1 %vm959_vm6, %v946_v32 }
 0x1ec   : > { %v1698_v28 = vpop.f32.mrf.mxu1 }
 0x1ed   : > { %v1629_v62 = vmul.f32 -1.442695, %v1698_v28 }
 0x1ee   : > { %v1010_v52 = vpop.f32.mrf.mxu1 }
 0x1ef   : > { %v1627_v8 = vmul.f32 -1.442695, %v1010_v52  ;;  %1784 = vpow2.f32 %v1629_v62 }
 0x1f0   : > { %v1699_v22 = vpop.f32.mrf.mxu1 }
 0x1f1   : > { %1786 = vpow2.f32 %v1627_v8  ;;  %v1630_v55 = vmul.f32 -1.442695, %v1699_v22 }
 0x1f2   : > { %v1013_v29 = vpop.f32.mrf.mxu1 }
 0x1f3   : > { %1788 = vpow2.f32 %v1630_v55  ;;  %v1628_v18 = vmul.f32 -1.442695, %v1013_v29 }
 0x1f4   : > { %v1702_v38 = vpop.f32.mrf.mxu1 }
 0x1f5   : > { %1790 = vpow2.f32 %v1628_v18  ;;  %v1633_v37 = vmul.f32 -1.442695, %v1702_v38  ;;  %v1645_v18 = vmul.f32 -1.442695, %v1977_v15 }
 0x1f6   : > { %v1026_v12 = vpop.f32.mrf.mxu1 }
 0x1f7   : > { %v1631_v39 = vmul.f32 -1.442695, %v1026_v12  ;;  %1792 = vpow2.f32 %v1633_v37 }
 0x1f8   : > { %v1703_v23 = vpop.f32.mrf.mxu1 }
 0x1f9   : > { %1794 = vpow2.f32 %v1631_v39  ;;  %v1634_v43 = vmul.f32 -1.442695, %v1703_v23 }
 0x1fa   : > { %v1029_v36 = vpop.f32.mrf.mxu1 }
 0x1fb   : > { %1796 = vpow2.f32 %v1634_v43  ;;  %v1632_v4 = vmul.f32 -1.442695, %v1029_v36 }
 0x1fc   : > { %v1785_v61 = vpop.eup %1784 }
 0x1fd   : > { %1798 = vpow2.f32 %v1632_v4  ;;  %v1067_v40 = vadd.f32 1.0, %v1785_v61 }
 0x1fe   : > { %v1787_v24 = vpop.eup %1786 }
 0x1ff   : > { %v1065_v5 = vadd.f32 1.0, %v1787_v24 }
 0x200   : > { %v1789_v44 = vpop.eup %1788 }
 0x201   : > { %v1068_v30 = vadd.f32 1.0, %v1789_v44  ;;  %1800 = vrcp.f32 %v1065_v5  ;;  %v2520_v44 = vld [vmem:[#allocation2_spill] sm:$0xff] }
 0x202   : > { %v1791_v56 = vpop.eup %1790 }
 0x203   : > { %1802 = vrcp.f32 %v1068_v30  ;;  %v1066_v60 = vadd.f32 1.0, %v1791_v56 }
 0x204   : > { %1804 = vrcp.f32 %v1067_v40  ;;  %v1793_v9 = vpop.eup %1792  ;;  %v1643_v40 = vmul.f32 -1.442695, %v2520_v44 }
 0x205   : > { %1806 = vrcp.f32 %v1066_v60  ;;  %v1071_v11 = vadd.f32 1.0, %v1793_v9 }
 0x206   : > { %v1795_v48 = vpop.eup %1794 }
 0x207   : > { %v1069_v51 = vadd.f32 1.0, %v1795_v48 }
 0x208   : > { %v1797_v7 = vpop.eup %1796 }
 0x209   : > { %v1072_v21 = vadd.f32 1.0, %v1797_v7  ;;  %1808 = vrcp.f32 %v1069_v51 }
 0x20a   : > { %v1799_v63 = vpop.eup %1798 }
 0x20b   : > { %1810 = vrcp.f32 %v1072_v21  ;;  %v1070_v16 = vadd.f32 1.0, %v1799_v63  ;;  %v2521_v21 = vld [vmem:[#allocation7_spill] sm:$0xff] }
 0x20c   : > { %1812 = vrcp.f32 %v1071_v11  ;;  %v1647_v63 = vmul.f32 -1.442695, %v2521_v21 }
 0x20d   : > { %1814 = vrcp.f32 %v1070_v16 }
 0x20e   : > { %v1801_v59 = vpop.eup %1800 }
 0x20f   : > { %v1089_v53 = vmul.f32 %v1801_v59, %v1010_v52 }
 0x210   : > { %v1803_v3 = vpop.eup %1802 }
 0x211   : > { %v1805_v27 = vpop.eup %1804  ;;  %v1092_v13 = vmul.f32 %v1803_v3, %v1699_v22 }
 0x212   : > { %v1807_v19 = vpop.eup %1806  ;;  %v1091_v6 = vmul.f32 %v1805_v27, %v1698_v28 }
 0x213   : > { %v1090_v35 = vmul.f32 %v1807_v19, %v1013_v29  ;;  %v1644_v29 = vmul.f32 -1.442695, %v2006_v31 }
 0x214   : > { %v1098_v50 = vpack.c.bf16 %v1092_v13, %v1091_v6 }
 0x215   : > { %v1097_v41 = vpack.c.bf16 %v1090_v35, %v1089_v53  ;;  %1816 = vpow2.f32 %v1644_v29  ;;  %v2522_v35 = vld [vmem:[#allocation4_spill] sm:$0xff] }
 0x216   : > { %v1809_v10 = vpop.eup %1808  ;;  %1818 = vpow2.f32 %v1645_v18  ;;  %v1649_v6 = vmul.f32 -1.442695, %v2522_v35 }
 0x217   : > { %1708 = vmatprep.mubr.msk.bf16.mxu0 %vm959_vm6, %v1097_v41  ;;  %v1093_v2 = vmul.f32 %v1809_v10, %v1026_v12 }
 0x218   : > { %v1811_v33 = vpop.eup %1810  ;;  %1709 = vmatmul.mubr.msk.bf16.vlgmr.msra.gmra.mxu0 %vm959_vm6, %v1098_v50 }
 0x219   : > { %v1813_v45 = vpop.eup %1812  ;;  %v1096_v57 = vmul.f32 %v1811_v33, %v1703_v23 }
 0x21a   : > { %v1815_v17 = vpop.eup %1814  ;;  %v1095_v34 = vmul.f32 %v1813_v45, %v1702_v38  ;;  %v2519_v38 = vld [vmem:[#allocation3_spill] sm:$0xff] }
 0x21b   : > { %v1094_v1 = vmul.f32 %v1815_v17, %v1029_v36  ;;  %v1646_v37 = vmul.f32 -1.442695, %v2519_v38 }
 0x21c   : > { %v1100_v42 = vpack.c.bf16 %v1096_v57, %v1095_v34 }
 0x21d   : > { %v1099_v0 = vpack.c.bf16 %v1094_v1, %v1093_v2  ;;  %1820 = vpow2.f32 %v1646_v37 }
 0x21e   : > { %1822 = vpow2.f32 %v1643_v40 }
 0x21f   : > { %1712 = vmatprep.mubr.msk.bf16.mxu0 %vm959_vm6, %v1099_v0  ;;  %1824 = vpow2.f32 %v1647_v63 }
 0x220   : > { %1713 = vmatmul.mubr.msk.bf16.gmra.mxu0 %vm959_vm6, %v1100_v42 }
 0x222   : > { %v1817_v51 = vpop.eup %1816 }
 0x223   : > { %v1353_v19 = vadd.f32 1.0, %v1817_v51  ;;  %v1819_v13 = vpop.eup %1818 }
 0x224   : > { %v1354_v33 = vadd.f32 1.0, %v1819_v13 }
 0x225   : > { %1826 = vrcp.f32 %v1353_v19 }
 0x226   : > { %1828 = vpow2.f32 %v1649_v6 }
 0x227   : > { %1830 = vrcp.f32 %v1354_v33 }
 0x22a   : > { %v1821_v45 = vpop.eup %1820 }
 0x22b   : > { %v1355_v1 = vadd.f32 1.0, %v1821_v45  ;;  %v1823_v42 = vpop.eup %1822 }
 0x22d   : > { %1832 = vrcp.f32 %v1355_v1 }
 0x2d8   : > { %v1710_v20 = vpop.f32.mrf.mxu0 }
 0x2d9   : > { %v1199_v14 = vsel %vm959_vm6, %v1710_v20, 0.0 }
 0x2da   : > { %1200 = vadd.xlane.f32.xlu1 %v1199_v14  ;;  %v1162_v25 = vpop.f32.mrf.mxu0  ;;  %v1352_v14 = vadd.f32 1.0, %v1823_v42 }
 0x2db   : > { %v1193_v26 = vsel %vm959_vm6, %v1162_v25, 0.0 }
 0x2dc   : > { %1194 = vadd.xlane.f32.xlu0 %v1193_v26  ;;  %v1711_v47 = vpop.f32.mrf.mxu0  ;;  %1834 = vrcp.f32 %v1352_v14 }
 0x2dd   : > { %v1202_v54 = vsel %vm959_vm6, %v1711_v47, 0.0 }
 0x2de   : > { %1203 = vadd.xlane.f32.xlu1 %v1202_v54  ;;  %v1165_v32 = vpop.f32.mrf.mxu0 }
 0x2df   : > { %v1196_v46 = vsel %vm959_vm6, %v1165_v32, 0.0 }
 0x2e0   : > { %1197 = vadd.xlane.f32.xlu0 %v1196_v46  ;;  %v1714_v49 = vpop.f32.mrf.mxu0 }
 0x2e1   : > { %v1211_v8 = vsel %vm959_vm6, %v1714_v49, 0.0 }
 0x2e2   : > { %v1178_v58 = vpop.f32.mrf.mxu0 }
 0x2e3   : > { %v1205_v28 = vsel %vm959_vm6, %v1178_v58, 0.0 }
 0x2e4   : > { %1206 = vadd.xlane.f32.xlu0 %v1205_v28  ;;  %v2356_v62 = vpop.f32.mrf.mxu0 }
 0x2e5   : > { %v1214_v55 = vsel %vm959_vm6, %v2356_v62, 0.0 }
 0x2e6   : > { %v2358_v52 = vpop.f32.mrf.mxu0 }
 0x2e7   : > { %v1208_v22 = vsel %vm959_vm6, %v2358_v52, 0.0 }
 0x2e8   : > { %1212 = vadd.xlane.f32.xlu0 %v1211_v8  ;;  %1209 = vadd.xlane.f32.xlu1 %v1208_v22 }
 0x2ec   : > { %1215 = vadd.xlane.f32.xlu1 %v1214_v55 }
 0x363   : > { %v1201_v12 = vpop.xlane.xlu1 %1200 }
 0x364   : > { %v1220_v39 = vmul.f32 0.041666668, %v1201_v12  ;;  %v2523_v12 = vld [vmem:[#allocation9_spill] sm:$0xff] }
 0x365   : > { %v1195_v23 = vpop.xlane.xlu0 %1194 }
 0x366   : > { %v2368_v43 = vsub.f32 %v1710_v20, %v1220_v39  ;;  %v1218_v36 = vmul.f32 0.041666668, %v1195_v23  ;;  %v1648_v39 = vmul.f32 -1.442695, %v2523_v12 }
 0x367   : > { %v1204_v4 = vpop.xlane.xlu1 %1203 }
 0x368   : > { %v2370_v61 = vsub.f32 %v1162_v25, %v1218_v36  ;;  %v1221_v24 = vmul.f32 0.041666668, %v1204_v4  ;;  %v1236_v5 = vmul.f32 %v2368_v43, %v2368_v43  ;;  %v1825_v25 = vpop.eup %1824  ;;  %v1750_v36 = vld [vmem:[%s2481_s9 + $0x8] ss:$0 sps:$4 sm:$0xff]   ;;  %v1751_v4 = vld [vmem:[%s2481_s9] sm:$0xff]  }
 0x369   : > { %v1198_v30 = vpop.xlane.xlu0 %1197  ;;  %v1827_v26 = vpop.eup %1826  ;;  %1730 = vmatprep.subr.msk.bf16.mxu1 %vm972_vm1, %v1750_v36 }
 0x36a   : > { %v2375_v56 = vsub.f32 %v1711_v47, %v1221_v24  ;;  %v1219_v60 = vmul.f32 0.041666668, %v1198_v30  ;;  %v1248_v9 = vsel %vm959_vm6, %v1236_v5, 0.0  ;;  %v1234_v48 = vmul.f32 %v2370_v61, %v2370_v61  ;;  %v1829_v54 = vpop.eup %1828 }
 0x36b   : > { %1249 = vadd.xlane.f32.xlu0 %v1248_v9  ;;  %v1356_v47 = vadd.f32 1.0, %v1825_v25  ;;  %v1831_v46 = vpop.eup %1830  ;;  %v1453_v5 = vsel %vm972_vm1, %v1750_v36, 0 }
 0x36c   : > { %v2380_v7 = vsub.f32 %v1165_v32, %v1219_v60  ;;  %v1237_v11 = vmul.f32 %v2375_v56, %v2375_v56  ;;  %v1242_v59 = vsel %vm959_vm6, %v1234_v48, 0.0  ;;  %v1377_v32 = vmul.f32 %v1827_v26, %v2006_v31  ;;  %v1833_v28 = vpop.eup %1832  ;;  %1717 = vmatpush3.bf16.msra.mxu1 %v1453_v5  ;;  %v1641_v26 = vld [vmem:[%s2479_s7] ss:$0 sm:$0xff] }
 0x36d   : > { %v1207_v16 = vpop.xlane.xlu0 %1206  ;;  %1836 = vrcp.f32 %v1356_v47  ;;  %v1379_v8 = vmul.f32 %v1833_v28, %v2519_v38  ;;  %v1835_v22 = vpop.eup %1834  ;;  %v2524_v38 = vld [vmem:[#allocation8_spill] sm:$0xff]  ;;  %1718 = vmatprep.subr.bf16.mxu1 %v1751_v4 }
 0x36e   : > { %v1251_v3 = vsel %vm959_vm6, %v1237_v11, 0.0  ;;  %v1235_v27 = vmul.f32 %v2380_v7, %v2380_v7  ;;  %v1222_v53 = vmul.f32 0.041666668, %v1207_v16  ;;  %v1376_v55 = vmul.f32 %v1835_v22, %v2520_v44 }
 0x36f   : > { %1243 = vadd.xlane.f32.xlu0 %v1242_v59  ;;  %1252 = vadd.xlane.f32.xlu1 %v1251_v3  ;;  %v1650_v23 = vmul.f32 -1.442695, %v2524_v38 }
 0x370   : > { %v1245_v10 = vsel %vm959_vm6, %v1235_v27, 0.0  ;;  %v2391_v17 = vsub.f32 %v1178_v58, %v1222_v53  ;;  %v1378_v58 = vmul.f32 %v1831_v46, %v1977_v15  ;;  %1719 = vmatpush3.bf16.msra.mxu1 %v1751_v4 }
 0x371   : > { %v1213_v41 = vpop.xlane.xlu0 %1212  ;;  %v1210_v37 = vpop.xlane.xlu1 %1209 }
 0x372   : > { %v1224_v50 = vmul.f32 0.041666668, %v1213_v41  ;;  %v1238_v0 = vmul.f32 %v2391_v17, %v2391_v17  ;;  %v1223_v40 = vmul.f32 0.041666668, %v1210_v37 }
 0x373   : > { %1246 = vadd.xlane.f32.xlu1 %v1245_v10 }
 0x374   : > { %v2393_v57 = vsub.f32 %v1714_v49, %v1224_v50  ;;  %v1254_v20 = vsel %vm959_vm6, %v1238_v0, 0.0  ;;  %v1358_v49 = vadd.f32 1.0, %v1829_v54  ;;  %v2427_v60 = vsub.f32 %v2358_v52, %v1223_v40 }
 0x375   : > { %v1216_v24 = vpop.xlane.xlu1 %1215 }
 0x376   : > { %v1240_v2 = vmul.f32 %v2393_v57, %v2393_v57  ;;  %1838 = vrcp.f32 %v1358_v49  ;;  %v1225_v44 = vmul.f32 0.041666668, %v1216_v24  ;;  %v1239_v11 = vmul.f32 %v2427_v60, %v2427_v60 }
 0x377   : > { %1840 = vpow2.f32 %v1648_v39 }
 0x378   : > { %v1260_v34 = vsel %vm959_vm6, %v1240_v2, 0.0  ;;  %1842 = vpow2.f32 %v1650_v23  ;;  %v2424_v30 = vsub.f32 %v2356_v62, %v1225_v44  ;;  %v1257_v59 = vsel %vm959_vm6, %v1239_v11, 0.0 }
 0x379   : > { %1261 = vadd.xlane.f32.xlu0 %v1260_v34 }
 0x37a   : > { %v1837_v31 = vpop.eup %1836  ;;  %v1241_v9 = vmul.f32 %v2424_v30, %v2424_v30 }
 0x37b   : > { %v1380_v29 = vmul.f32 %v1837_v31, %v2521_v21 }
 0x37c   : > { %v1263_v51 = vsel %vm959_vm6, %v1241_v9, 0.0 }
 0x37d   : > { %1255 = vadd.xlane.f32.xlu0 %v1254_v20 }
 0x383   : > { %v1839_v18 = vpop.eup %1838 }
 0x384   : > { %1394 = vrot.lane.b32.xlu1 %v1377_v32, %s1873_s15  ;;  %v1382_v15 = vmul.f32 %v1839_v18, %v2522_v35  ;;  %v1841_v48 = vpop.eup %1840 }
 0x385   : > { %v1357_v21 = vadd.f32 1.0, %v1841_v48  ;;  %v1843_v63 = vpop.eup %1842 }
 0x386   : > { %v1359_v16 = vadd.f32 1.0, %v1843_v63 }
 0x387   : > { %1844 = vrcp.f32 %v1357_v21 }
 0x388   : > { %1396 = vrot.lane.b32.xlu1 %v1378_v58, %s1873_s15  ;;  %1846 = vrcp.f32 %v1359_v16 }
 0x38c   : > { %1398 = vrot.lane.b32.xlu1 %v1379_v8, %s1873_s15 }
 0x393   : > { %1392 = vrot.lane.b32.xlu0 %v1376_v55, %s1873_s15 }
 0x394   : > { %v1845_v62 = vpop.eup %1844 }
 0x395   : > { %v1381_v52 = vmul.f32 %v1845_v62, %v2523_v12  ;;  %v1847_v3 = vpop.eup %1846 }
 0x396   : > { %v1383_v27 = vmul.f32 %v1847_v3, %v2524_v38 }
 0x397   : > { %1400 = vrot.lane.b32.xlu0 %v1380_v29, %s1873_s15 }
 0x39b   : > { %1404 = vrot.lane.b32.xlu0 %v1382_v15, %s1873_s15 }
 0x3b0   : > { %1264 = vadd.xlane.f32.xlu1 %v1263_v51 }
 0x3b4   : > { %1258 = vadd.xlane.f32.xlu1 %v1257_v59 }
 0x3c5   : > { %1402 = vrot.lane.b32.xlu1 %v1381_v52, %s1873_s15 }
 0x3c9   : > { %1406 = vrot.lane.b32.xlu1 %v1383_v27, %s1873_s15 }
 0x3f4   : > { %v1250_v19 = vpop.xlane.xlu0 %1249 }
 0x3f5   : > { %v1268_v13 = vmul.f32 0.041666668, %v1250_v19 }
 0x3f7   : > { %v1276_v53 = vadd.f32 1e-05, %v1268_v13 }
 0x3f8   : > { %v1244_v35 = vpop.xlane.xlu0 %1243  ;;  %v1253_v6 = vpop.xlane.xlu1 %1252 }
 0x3f9   : > { %v1266_v41 = vmul.f32 0.041666668, %v1244_v35  ;;  %v1269_v50 = vmul.f32 0.041666668, %v1253_v6  ;;  %1848 = vrsqrt.f32 %v1276_v53 }
 0x3fb   : > { %v1274_v10 = vadd.f32 1e-05, %v1266_v41  ;;  %v1277_v33 = vadd.f32 1e-05, %v1269_v50 }
 0x3fc   : > { %v1247_v45 = vpop.xlane.xlu1 %1246 }
 0x3fd   : > { %1850 = vrsqrt.f32 %v1274_v10  ;;  %v1267_v2 = vmul.f32 0.041666668, %v1247_v45 }
 0x3fe   : > { %1852 = vrsqrt.f32 %v1277_v33 }
 0x3ff   : > { %v1275_v1 = vadd.f32 1e-05, %v1267_v2 }
 0x400   : > { %v1395_v0 = vpop.permute.xlu1 %1394 }
 0x401   : > { %1854 = vrsqrt.f32 %v1275_v1 }
 0x402   : > { %v1262_v42 = vpop.xlane.xlu0 %1261 }
 0x403   : > { %v1272_v4 = vmul.f32 0.041666668, %v1262_v42 }
 0x404   : > { %v1397_v32 = vpop.permute.xlu1 %1396 }
 0x405   : > { %v1280_v5 = vadd.f32 1e-05, %v1272_v4 }
 0x406   : > { %v1849_v34 = vpop.eup %1848  ;;  %v1256_v28 = vpop.xlane.xlu0 %1255 }
 0x407   : > { %v1292_v14 = vmul.f32 %v1849_v34, %v2368_v43  ;;  %v1642_v43 = vld [vmem:[%s2480_s8] ss:$0 sm:$0xff] }
 0x409   : > { %v1307_v58 = vmul.f32 %v1641_v26, %v1292_v14 }
 0x40a   : > { %v1851_v20 = vpop.eup %1850 }
 0x40b   : > { %v1853_v25 = vpop.eup %1852  ;;  %v1290_v47 = vmul.f32 %v1851_v20, %v2370_v61  ;;  %v1322_v18 = vadd.f32 %v1642_v43, %v1307_v58  ;;  %v1399_v61 = vpop.permute.xlu1 %1398 }
 0x40c   : > { %v1293_v54 = vmul.f32 %v1853_v25, %v2375_v56  ;;  %v1393_v56 = vpop.permute.xlu0 %1392 }
 0x40d   : > { %v1305_v46 = vmul.f32 %v1641_v26, %v1290_v47  ;;  %v1418_v38 = vmul.f32 %v1397_v32, %v1322_v18 }
 0x40e   : > { %v1855_v49 = vpop.eup %1854  ;;  %v1308_v8 = vmul.f32 %v1641_v26, %v1293_v54 }
 0x40f   : > { %v1291_v22 = vmul.f32 %v1855_v49, %v2380_v7  ;;  %v1320_v29 = vadd.f32 %v1642_v43, %v1305_v46  ;;  %v1270_v7 = vmul.f32 0.041666668, %v1256_v28 }
 0x410   : > { %v1323_v55 = vadd.f32 %v1642_v43, %v1308_v8  ;;  %v1401_v35 = vpop.permute.xlu0 %1400 }
 0x411   : > { %v1306_v31 = vmul.f32 %v1641_v26, %v1291_v22  ;;  %v1416_v39 = vmul.f32 %v1393_v56, %v1320_v29  ;;  %v1278_v24 = vadd.f32 1e-05, %v1270_v7 }
 0x412   : > { %v1419_v37 = vmul.f32 %v1399_v61, %v1323_v55 }
 0x413   : > { %v1321_v15 = vadd.f32 %v1642_v43, %v1306_v31  ;;  %1856 = vrsqrt.f32 %v1278_v24 }
 0x414   : > { %v1425_v36 = vpack.c.bf16 %v1419_v37, %v1418_v38  ;;  %1858 = vrsqrt.f32 %v1280_v5 }
 0x415   : > { %v1417_v12 = vmul.f32 %v1395_v0, %v1321_v15 }
 0x417   : > { %v1424_v23 = vpack.c.bf16 %v1417_v12, %v1416_v39 }
 0x419   : > { %1720 = vmatprep.mubr.msk.bf16.mxu1 %vm959_vm6, %v1424_v23 }
 0x41a   : > { %1721 = vmatmul.mubr.msk.bf16.vlgmr.msra.gmra.mxu1 %vm959_vm6, %v1425_v36 }
 0x420   : > { %v1857_v21 = vpop.eup %1856 }
 0x421   : > { %v1859_v63 = vpop.eup %1858  ;;  %v1294_v16 = vmul.f32 %v1857_v21, %v2391_v17 }
 0x422   : > { %v1296_v62 = vmul.f32 %v1859_v63, %v2393_v57  ;;  %v1405_v57 = vpop.permute.xlu0 %1404 }
 0x423   : > { %v1309_v3 = vmul.f32 %v1641_v26, %v1294_v16 }
 0x424   : > { %v1311_v53 = vmul.f32 %v1641_v26, %v1296_v62 }
 0x425   : > { %v1324_v50 = vadd.f32 %v1642_v43, %v1309_v3 }
 0x426   : > { %v1326_v33 = vadd.f32 %v1642_v43, %v1311_v53 }
 0x427   : > { %v1420_v1 = vmul.f32 %v1401_v35, %v1324_v50 }
 0x439   : > { %v1265_v44 = vpop.xlane.xlu1 %1264 }
 0x43a   : > { %v1273_v40 = vmul.f32 0.041666668, %v1265_v44 }
 0x43c   : > { %v1281_v9 = vadd.f32 1e-05, %v1273_v40 }
 0x43d   : > { %v1259_v48 = vpop.xlane.xlu1 %1258 }
 0x43e   : > { %1860 = vrsqrt.f32 %v1281_v9  ;;  %v1271_v51 = vmul.f32 0.041666668, %v1259_v48 }
 0x440   : > { %v1279_v11 = vadd.f32 1e-05, %v1271_v51 }
 0x441   : > { %v1403_v27 = vpop.permute.xlu1 %1402 }
 0x442   : > { %1862 = vrsqrt.f32 %v1279_v11 }
 0x445   : > { %v1407_v17 = vpop.permute.xlu1 %1406 }
 0x44b   : > { %v1861_v59 = vpop.eup %1860 }
 0x44c   : > { %v1297_v52 = vmul.f32 %v1861_v59, %v2424_v30  ;;  %v1422_v30 = vmul.f32 %v1405_v57, %v1326_v33 }
 0x44e   : > { %v1312_v19 = vmul.f32 %v1641_v26, %v1297_v52 }
 0x44f   : > { %v1863_v13 = vpop.eup %1862 }
 0x450   : > { %v1295_v6 = vmul.f32 %v1863_v13, %v2427_v60  ;;  %v1327_v41 = vadd.f32 %v1642_v43, %v1312_v19 }
 0x452   : > { %v1310_v10 = vmul.f32 %v1641_v26, %v1295_v6  ;;  %v1423_v2 = vmul.f32 %v1407_v17, %v1327_v41 }
 0x454   : > { %v1325_v45 = vadd.f32 %v1642_v43, %v1310_v10  ;;  %v1427_v42 = vpack.c.bf16 %v1423_v2, %v1422_v30 }
 0x456   : > { %v1421_v34 = vmul.f32 %v1403_v27, %v1325_v45 }
 0x458   : > { %v1426_v0 = vpack.c.bf16 %v1421_v34, %v1420_v1 }
 0x45a   : > { %1724 = vmatprep.mubr.msk.bf16.mxu1 %vm959_vm6, %v1426_v0 }
 0x45b   : > { %1725 = vmatmul.mubr.msk.bf16.gmra.mxu1 %vm959_vm6, %v1427_v42 }
 0x4da   : > { %v1722_v60 = vpop.f32.mrf.mxu1 }
 0x4db   : > { %1522 = vst.msk [vmem:[%s361_s28 + $0x10] sm:$0xff] %vm400_vm0, %v1722_v60 }
 0x4dc   : > { %v1489_v20 = vpop.f32.mrf.mxu1 }
 0x4dd   : > { %1520 = vst.msk [vmem:[%s361_s28] sm:$0xff] %vm400_vm0, %v1489_v20 }
 0x4de   : > { %v1723_v14 = vpop.f32.mrf.mxu1 }
 0x4df   : > { %1523 = vst.msk [vmem:[%s361_s28 + $0x18] sm:$0xff] %vm400_vm0, %v1723_v14 }
 0x4e0   : > { %v1492_v25 = vpop.f32.mrf.mxu1 }
 0x4e1   : > { %1521 = vst.msk [vmem:[%s361_s28 + $0x8] sm:$0xff] %vm400_vm0, %v1492_v25 }
 0x51b   : > { %v1726_v26 = vpop.f32.mrf.mxu1 }
 0x51c   : > { %1526 = vst.msk [vmem:[%s361_s28 + $0x30] sm:$0xff] %vm400_vm0, %v1726_v26 }
 0x51d   : > { %v1505_v47 = vpop.f32.mrf.mxu1 }
 0x51e   : > { %1524 = vst.msk [vmem:[%s361_s28 + $0x20] sm:$0xff] %vm400_vm0, %v1505_v47 }
 0x51f   : > { %v1727_v54 = vpop.f32.mrf.mxu1 }
 0x520   : > { %1527 = vst.msk [vmem:[%s361_s28 + $0x38] sm:$0xff] %vm400_vm0, %v1727_v54 }
 0x521   : > { %v1508_v32 = vpop.f32.mrf.mxu1 }
 0x522   : > { %1525 = vst.msk [vmem:[%s361_s28 + $0x28] sm:$0xff] %vm400_vm0, %v1508_v32 }
 0x523 PF: > { %s20_s13 = sadd.s32 1, %s1870_s13  }
 0x524   : > { %p17_p4 = scmp.ge.s32.totalorder %s20_s13, 4  }
 0x526   :  { %19 = sbr.rel (!%p17_p4) target bundleno = 1 (0x1), region = 90 }

</bundles_post_ra>
